<compile_context>
chip_gen: v6e
topology: v6e:2x2x1
jax: 0.10.0
libtpu: 0.0.40
codegen_flags: <defaults>
</compile_context>

<pallas_src>
import jax
import jax.numpy as jnp
from jax.experimental import pallas as pl
from jax.experimental.pallas import tpu as pltpu


def _make_sepconv_kernel(img_w: int):
    """Kernel factory; img_w (image width) is a static closure constant."""
    shifts = tuple(ki * img_w + kj for ki in range(3) for kj in range(3))

    def kernel(x_ref, w_ref, o_ref):
        # x_ref: (C, L)      lane-dense flattened pixels, L = nb*HW_PAD
        # w_ref: (O, 9C+1)   folded dw*pw*bn_scale weights + shift column
        # o_ref: (O, L)      lane-dense output slab
        x = x_ref[...]
        L = x.shape[1]
        # Tap t must read pixel (i+ki, j+kj) for output pixel (i, j): that is
        # a left-rotation by ki*W+kj of the flattened grid.  Valid output
        # columns never read past their batch element's HW_PAD region, so the
        # wraparound only lands in columns the wrapper discards.
        taps = [x if s == 0 else pltpu.roll(x, shift=L - s, axis=1)
                for s in shifts]
        ones = jnp.ones((1, L), dtype=x.dtype)          # bias row for the shift
        patch = jnp.concatenate(taps + [ones], axis=0)  # (9C+1, L), registers
        # Single MXU matmul: depthwise + pointwise + BN scale + shift.
        y = jnp.dot(w_ref[...], patch, preferred_element_type=jnp.float32)
        o_ref[...] = (y * jax.nn.sigmoid(y)).astype(o_ref.dtype)  # SiLU (f32)

    return kernel


def separable_conv2d(x, dw_w, pw_w, pw_b, bn_gamma, bn_beta, bn_mean, bn_var,
                     eps=1e-3):
    """x: (N, C, H, W). dw_w: (C, 1, 3, 3). pw_w: (O, C). pw_b/bn_*: (O,)."""
    N, C, H, W = x.shape
    O = pw_w.shape[0]
    Ho, Wo = H - 2, W - 2
    hw = H * W
    hw_pad = ((hw + 127) // 128) * 128               # lane-dense pixel grid

    # --- batch folding: nb batch elements per grid step (lane dim L) --------
    nb = max(1, min(N, 2048 // max(hw_pad, 1)))
    # keep >= 2 parallel grid steps when N allows (v7x has 2 TensorCores/chip)
    while nb > 1 and pl.cdiv(N, nb) < 2:
        nb //= 2
    grid_n = pl.cdiv(N, nb)
    n_pad = grid_n * nb
    L = nb * hw_pad
    kdim = 9 * C + 1

    # --- fold BN (eval-mode running stats) + pointwise bias ------------------
    inv_std = 1.0 / jnp.sqrt(bn_var.astype(jnp.float32) + eps)
    scale = bn_gamma.astype(jnp.float32) * inv_std                      # (O,)
    shift = ((pw_b.astype(jnp.float32) - bn_mean.astype(jnp.float32)) * scale
             + bn_beta.astype(jnp.float32))                             # (O,)

    # w_eff[o, t*C + c] = scale[o] * pw[o, c] * dw[c, ki, kj],  t = 3*ki + kj
    dw = dw_w.reshape(C, 9).astype(jnp.float32)                         # (C, 9)
    w_eff = (scale[:, None, None]
             * pw_w.astype(jnp.float32)[:, :, None]
             * dw[None, :, :])                                          # (O, C, 9)
    w_eff = jnp.transpose(w_eff, (0, 2, 1)).reshape(O, 9 * C)           # (O, 9C)
    w_aug = jnp.concatenate([w_eff, shift[:, None]], axis=1)            # (O, 9C+1)

    # --- lane-dense flattened input: (C, n_pad * hw_pad) ---------------------
    x_flat = x.reshape(N, C, hw).astype(jnp.float32)
    x_flat = jnp.pad(x_flat, ((0, n_pad - N), (0, 0), (0, hw_pad - hw)))
    x2 = jnp.transpose(x_flat, (1, 0, 2)).reshape(C, n_pad * hw_pad)

    # bf16 MXU operands only pay off (and only cost accuracy) at real sizes.
    use_bf16 = kdim >= 128 and L >= 1024
    mm_dtype = jnp.bfloat16 if use_bf16 else jnp.float32

    # --- VMEM budget (double-buffered blocks + register-resident patch) ------
    isz = jnp.dtype(mm_dtype).itemsize
    vmem_need = (2 * C * L * isz            # input block (double-buffered)
                 + 2 * O * L * 4            # output block (f32, double-buffered)
                 + 2 * O * kdim * isz       # weights
                 + (kdim + 8) * L * isz     # patch (spill headroom)
                 + 2 * O * L * 4)           # accumulator / epilogue temps
    vmem_limit = int(min(max(vmem_need + (4 << 20), 32 << 20), 64 << 20))

    out_flat = pl.pallas_call(
        _make_sepconv_kernel(W),
        out_shape=jax.ShapeDtypeStruct((O, n_pad * hw_pad), jnp.float32),
        grid=(grid_n,),
        in_specs=[
            pl.BlockSpec((C, L), lambda g: (0, g)),
            pl.BlockSpec((O, kdim), lambda g: (0, 0)),
        ],
        out_specs=pl.BlockSpec((O, L), lambda g: (0, g)),
        compiler_params=pltpu.CompilerParams(
            dimension_semantics=("parallel",),
            vmem_limit_bytes=vmem_limit),
    )(x2.astype(mm_dtype), w_aug.astype(mm_dtype))

    # Drop pad batch/pixel columns, keep the valid (Ho, Wo) window, go NCHW.
    out = out_flat.reshape(O, n_pad, hw_pad)[:, :N, :hw].reshape(O, N, H, W)
    return jnp.transpose(out[:, :, :Ho, :Wo], (1, 0, 2, 3))


if __name__ == "__main__":
    key = jax.random.PRNGKey(0)
    kx, kdw, kpw, kpb, kg, kb, km, kv = jax.random.split(key, 8)

    N, Cin, H, W = 2, 4, 16, 16
    Cout = 8  # out_channels; channel_multiplier = 1.0

    x = jax.random.normal(kx, (N, Cin, H, W), jnp.float32)
    dw_w = 0.1 * jax.random.normal(kdw, (Cin, 1, 3, 3), jnp.float32)   # groups=Cin, no bias
    pw_w = 0.1 * jax.random.normal(kpw, (Cout, Cin), jnp.float32)      # 1x1 conv weight
    pw_b = 0.1 * jax.random.normal(kpb, (Cout,), jnp.float32)          # 1x1 conv bias
    gamma = 1.0 + 0.1 * jax.random.normal(kg, (Cout,), jnp.float32)    # BN weight
    beta = 0.1 * jax.random.normal(kb, (Cout,), jnp.float32)           # BN bias
    mean = 0.1 * jax.random.normal(km, (Cout,), jnp.float32)           # BN running_mean
    var = jnp.abs(jax.random.normal(kv, (Cout,), jnp.float32)) + 0.5   # BN running_var

    out = separable_conv2d(x, dw_w, pw_w, pw_b, gamma, beta, mean, var)
    out = jax.block_until_ready(out)

    # Pure-JAX reference for correctness.
    dn = ("NCHW", "OIHW", "NCHW")
    ref = jax.lax.conv_general_dilated(x, dw_w, (1, 1), "VALID",
                                       dimension_numbers=dn,
                                       feature_group_count=Cin)
    ref = jax.lax.conv_general_dilated(ref, pw_w.reshape(Cout, Cin, 1, 1), (1, 1),
                                       "VALID", dimension_numbers=dn)
    ref = ref + pw_b[None, :, None, None]
    eps = 1e-3
    ref = ((ref - mean[None, :, None, None])
           / jnp.sqrt(var + eps)[None, :, None, None]
           * gamma[None, :, None, None] + beta[None, :, None, None])
    ref = ref * jax.nn.sigmoid(ref)

    assert out.shape == (N, Cout, H - 2, W - 2)
    # All FLOPs run through the MXU's f32 multi-pass path; summation order
    # differs slightly from the XLA conv reference.
    assert jnp.allclose(out, ref, atol=5e-4, rtol=5e-4), float(jnp.max(jnp.abs(out - ref)))
    print("KERNEL_OK")
</pallas_src>

<mosaic_0001>
module attributes {stable_mosaic.version = 11 : i64} {
  func.func @kernel(%arg0: i32, %arg1: memref<4x256xf32, #tpu.memory_space<vmem>>, %arg2: memref<8x37xf32, #tpu.memory_space<vmem>>, %arg3: memref<8x256xf32, #tpu.memory_space<vmem>>) attributes {dimension_semantics = [#tpu.dimension_semantics<parallel>], iteration_bounds = array<i64: 2>, scalar_prefetch = 0 : i64, scratch_operands = 0 : i64, tpu.core_type = #tpu.core_type<tc>, window_params = [{transform_indices = @transform_0, window_bounds = array<i64: 4, 256>}, {pipeline_mode = #tpu.pipeline_mode<synchronous>, transform_indices = @transform_1, window_bounds = array<i64: 8, 37>}, {transform_indices = @transform_2, window_bounds = array<i64: 8, 256>}]} {
    %c0 = arith.constant 0 : index
    %c0_0 = arith.constant 0 : index
    %0 = vector.load %arg1[%c0, %c0_0] : memref<4x256xf32, #tpu.memory_space<vmem>>, vector<4x256xf32>
    %c255_i32 = arith.constant 255 : i32
    %1 = tpu.dynamic_rotate %0 by %c255_i32 dim 1 : vector<4x256xf32>, i32 -> vector<4x256xf32>
    %c254_i32 = arith.constant 254 : i32
    %2 = tpu.dynamic_rotate %0 by %c254_i32 dim 1 : vector<4x256xf32>, i32 -> vector<4x256xf32>
    %c240_i32 = arith.constant 240 : i32
    %3 = tpu.dynamic_rotate %0 by %c240_i32 dim 1 : vector<4x256xf32>, i32 -> vector<4x256xf32>
    %c239_i32 = arith.constant 239 : i32
    %4 = tpu.dynamic_rotate %0 by %c239_i32 dim 1 : vector<4x256xf32>, i32 -> vector<4x256xf32>
    %c238_i32 = arith.constant 238 : i32
    %5 = tpu.dynamic_rotate %0 by %c238_i32 dim 1 : vector<4x256xf32>, i32 -> vector<4x256xf32>
    %c224_i32 = arith.constant 224 : i32
    %6 = tpu.dynamic_rotate %0 by %c224_i32 dim 1 : vector<4x256xf32>, i32 -> vector<4x256xf32>
    %c223_i32 = arith.constant 223 : i32
    %7 = tpu.dynamic_rotate %0 by %c223_i32 dim 1 : vector<4x256xf32>, i32 -> vector<4x256xf32>
    %c222_i32 = arith.constant 222 : i32
    %8 = tpu.dynamic_rotate %0 by %c222_i32 dim 1 : vector<4x256xf32>, i32 -> vector<4x256xf32>
    %cst = arith.constant 1.000000e+00 : f32
    %9 = vector.broadcast %cst : f32 to vector<1x256xf32>
    %10 = tpu.concatenate %0, %1, %2, %3, %4, %5, %6, %7, %8, %9 in 0 : vector<4x256xf32>, vector<4x256xf32>, vector<4x256xf32>, vector<4x256xf32>, vector<4x256xf32>, vector<4x256xf32>, vector<4x256xf32>, vector<4x256xf32>, vector<4x256xf32>, vector<1x256xf32> -> vector<37x256xf32>
    %c0_1 = arith.constant 0 : index
    %c0_2 = arith.constant 0 : index
    %11 = vector.load %arg2[%c0_1, %c0_2] : memref<8x37xf32, #tpu.memory_space<vmem>>, vector<8x37xf32>
    %cst_3 = arith.constant dense<0.000000e+00> : vector<8x256xf32>
    %12 = tpu.matmul %11, %10, %cst_3 {dimension_numbers = #tpu.dot_dimension_numbers<[1], [0], [0], [1], [0, 0, 1, 1], [], []>} : vector<8x37xf32>, vector<37x256xf32>, vector<8x256xf32> -> vector<8x256xf32>
    %13 = arith.negf %12 : vector<8x256xf32>
    %14 = math.exp %13 : vector<8x256xf32>
    %cst_4 = arith.constant 1.000000e+00 : f32
    %15 = vector.broadcast %cst_4 : f32 to vector<8x256xf32>
    %16 = arith.addf %15, %14 : vector<8x256xf32>
    %17 = arith.divf %15, %16 : vector<8x256xf32>
    %18 = arith.mulf %12, %17 : vector<8x256xf32>
    %c0_5 = arith.constant 0 : index
    %c0_6 = arith.constant 0 : index
    %19 = vector.load %arg3[%c0_5, %c0_6] : memref<8x256xf32, #tpu.memory_space<vmem>>, vector<8x256xf32>
    tpu.vector_store %arg3[%c0_5, %c0_6], %18 {strides = array<i32>} : memref<8x256xf32, #tpu.memory_space<vmem>>, vector<8x256xf32>,
    return
  }
  func.func @transform_0(%arg0: i32) -> (i32, i32) {
    %c0_i32 = arith.constant 0 : i32
    %c0_i32_0 = arith.constant 0 : i32
    return %c0_i32, %arg0 : i32, i32
  }
  func.func @transform_1(%arg0: i32) -> (i32, i32) {
    %c0_i32 = arith.constant 0 : i32
    %c0_i32_0 = arith.constant 0 : i32
    %c0_i32_1 = arith.constant 0 : i32
    return %c0_i32, %c0_i32_0 : i32, i32
  }
  func.func @transform_2(%arg0: i32) -> (i32, i32) {
    %c0_i32 = arith.constant 0 : i32
    %c0_i32_0 = arith.constant 0 : i32
    return %c0_i32, %arg0 : i32, i32
  }
}

</mosaic_0001>

<bundles_post_ra>
// kernel: tpu_custom_call.1
= control target key start
LH: loop header
LB: loop body
LE: loop exit
PB: predicated region body
PF: predicated region fallthrough
CT: control target
= control target key end

     0   :  { %7 = vsyncpa [#allocation3], 0  ;;  %s926_s0 = inlined_call_operand.hbm [shape: f32[4,512], index: 0, kind: input, shape index: {}]   ;;  %s927_s1 = inlined_call_operand.hbm [shape: f32[8,37], index: 1, kind: input, shape index: {}]   ;;  %s928_s2 = inlined_call_operand.hbm [shape: f32[8,512], index: 2, kind: output, shape index: {}]  }
   0x1   :  { %9 = vsyncpa [#allocation3 + $0x1], 0 }
   0x2   :  { %10 = vsyncpa [#allocation6], 0 }
   0x3   :  { %11 = vsyncpa [#allocation4], 0 }
   0x4   :  { %13 = vsyncpa [#allocation4 + $0x1], 0  ;;  %s715_s9 = smov 0   ;;  %s717_s10 = smov 0  }
   0x5   :  { %s719_s11 = smov 0   ;;  %s721_s12 = smov 0  }
   0x6 LB: > { %s736_s13 = sadd.s32 4294967295, %s686_s12   ;;  %s466_s14 = sadd.s32 4294967294, %s686_s12   ;;  %s686_s12 = sphi %s721_s12, %s951_s12   ;;  %s682_s11 = sphi %s719_s11, %s950_s11   ;;  %s678_s10 = sphi %s717_s10, %s949_s10   ;;  %s674_s9 = sphi %s715_s9, %s948_s9  }
   0x7   : > { %p39_p0 = scmp.ne.s32.totalorder %s678_s10, %s674_s9  ;;  %p929_p1 = scmp.eq.s32.totalorder %s736_s13, 0 }
   0x8   : > { %p90_p3 = scmp.eq.s32.totalorder %s466_s14, 1  ;;  %p467_p5 = scmp.ge.s32.totalorder %s686_s12, 1 }
   0x9   : > { %p745_p4 = por %p929_p1, %p39_p0  ;;  %p97_p7 = scmp.lt.s32.totalorder %s686_s12, 3 }
   0xa   : > { %p750_p6 = por %p90_p3, %p39_p0  ;;  %s688_s18 = smov [#allocation5]  }
   0xb   : > { %s933_s15 = scalar_select %p745_p4, 1, 0 }
   0xc   : > { %s934_s16 = scalar_select %p750_p6, 1, 0 }
   0xd   : > { %p755_p8 = pnand %p467_p5, %p97_p7  ;;  %s110_s19 = sshll.u32 %s688_s18, 4  ;;  %s111_s19 = int_to_ptr.vmem [resolvable:$true] %s110_s19 }
   0xe   : > { %s763_s20 = sadd.s32 1, %s686_s12   ;;  %s26_s24 = sadd.s32 1, %s682_s11 }
   0xf   : > { %s935_s17 = scalar_select %p755_p8, 1, 0 }
  0x10   : > { %p497_p10 = pneg %p755_p8  ;;  %s23_s22 = ssub.s32 %s686_s12, %s763_s20 }
  0x11   : > { %p773_p12 = scmp.eq.s32.totalorder %s23_s22, 0  ;;  %p33_p13 = scmp.ne.s32.totalorder %s682_s11, %s678_s10 }
  0x12   : > { %p767_p11 = pnand %p497_p10, %p929_p1  ;;  %s575_s25 = scalar_lea.vmem %s111_s19, 128 }
  0x13   : > { %p576_p3 = scmp.ne.s32.totalorder %s111_s19, %s575_s25  ;;  %p583_p9 = scmp.lt.s32.totalorder %s111_s19, %s111_s19 }
  0x14   : > { %p566_p0 = pneg %p767_p11  ;;  %p584_p2 = scmp.lt.s32.totalorder %s575_s25, %s575_s25 }
  0x16   : > { %p578_p5 = pnand %p576_p3, %p566_p0  ;;  %p585_p10 = por %p584_p2, %p583_p9 }
  0x18   : > { %p579_p7 = pneg %p578_p5 }
  0x1a   : > { %p586_p1 = pnand %p585_p10, %p579_p7 }
  0x1c   : > { %589 = shalt.err (!%p586_p1)
}
  0x1d   : > { %500 = dma.hbm_to_vmem [thread:$0]  (!%p767_p11), %s927_s1, 128, %s111_s19, [#allocation6]  }
  0x1e   : > { %s790_s28 = scalar_select %p773_p12, %s682_s11, %s26_s24  }
  0x1f   : > { %p34_p1 = scmp.eq.s32.totalorder %s686_s12, 0  ;;  %p938_p2 = scmp.eq.s32.totalorder %s736_s13, 1 }
  0x20   : > { %p510_p0 = scmp.lt.s32.totalorder %s686_s12, 2  ;;  %s121_s30 = sand.u32 1, %s682_s11  }
  0x21   : > { %p798_p9 = por %p938_p2, %p33_p13  ;;  %p35_p3 = por %p34_p1, %p33_p13 }
  0x22   : > { %s470_s3 = sshll.u32 %s121_s30, 3  ;;  %s487_s4 = sshll.u32 %s686_s12, 7 }
  0x23   : > { %s939_s29 = scalar_select %p798_p9, 1, 0 }
  0x24   : > { %s811_s7 = scalar_lea.hbm %s926_s0, %s487_s4  ;;  %s125_s8 = scalar_lea.vmem [#allocation2], %s470_s3 }
  0x25   : > { %s133_s14 = sshll.u32 %s125_s8, 4  ;;  %p813_p11 = pnand %p510_p0, %p35_p3  ;;  %s134_s14 = int_to_ptr.vmem [resolvable:$true] %s133_s14 }
  0x26   : > { %s122_s19 = scalar_lea.sflag [#allocation3], %s121_s30  ;;  %s590_s21 = scalar_lea.hbm %s811_s7, 128 }
  0x27   : > { %p591_p12 = scmp.ne.s32.totalorder %s811_s7, %s590_s21  ;;  %p592_p13 = pneg %p813_p11 }
  0x28   : > { %s595_s24 = scalar_lea.hbm %s926_s0, 256  ;;  %p596_p10 = scmp.lt.s32.totalorder %s811_s7, %s926_s0 }
  0x29   : > { %p593_p5 = pnand %p592_p13, %p591_p12  ;;  %p597_p1 = scmp.lt.s32.totalorder %s595_s24, %s590_s21 }
  0x2b   : > { %p594_p7 = pneg %p593_p5  ;;  %p598_p2 = por %p597_p1, %p596_p10 }
  0x2d   : > { %p599_p0 = pnand %p598_p2, %p594_p7 }
  0x2f   : > { %602 = shalt.err (!%p599_p0)
}
  0x30   : > { %s603_s27 = scalar_lea.vmem %s134_s14, 128  ;;  %s689_s30 = smov [#allocation2]  }
  0x31   : > { %p604_p3 = scmp.ne.s32.totalorder %s134_s14, %s603_s27  ;;  %s608_s3 = sshll.u32 %s689_s30, 4  ;;  %s609_s3 = int_to_ptr.vmem [resolvable:$false] %s608_s3 }
  0x32   : > { %s610_s4 = scalar_lea.vmem %s609_s3, 256  ;;  %p611_p12 = scmp.lt.s32.totalorder %s134_s14, %s609_s3 }
  0x33   : > { %p606_p6 = pnand %p604_p3, %p592_p13  ;;  %p612_p5 = scmp.lt.s32.totalorder %s610_s4, %s603_s27 }
  0x35   : > { %p607_p9 = pneg %p606_p6  ;;  %p613_p4 = por %p612_p5, %p611_p12 }
  0x37   : > { %p614_p8 = pnand %p613_p4, %p607_p9 }
  0x39   : > { %617 = shalt.err (!%p614_p8)
}
  0x3a   : > { %504 = dma.hbm_to_vmem [thread:$0]  (!%p813_p11), %s811_s7, 128, %s134_s14, %s122_s19  }
  0x3b   : > { %p941_p7 = scmp.ne.s32.totalorder %s935_s17, 0 }
  0x3c   : > { %s834_s5 = sand.u32 (!%p941_p7), 1, %s678_s10   ;;  %p942_p6 = scmp.ne.s32.totalorder (!%p941_p7), %s933_s15, 0 }
  0x3d   : > { %142 = sbr.rel (%p941_p7) target bundleno = 462 (0x1ce), region = 28  ;;  %s474_s6 = sshll.u32 (!%p941_p7), %s834_s5, 3 }
  0x3e   : > { %s145_s8 = scalar_lea.sflag (!%p941_p7), [#allocation3], %s834_s5  ;;  %s148_s21 = scalar_lea.vmem (!%p941_p7), [#allocation2], %s474_s6 }
  0x42   : > { %661 = dma.done.wait (%p942_p6), %s145_s8, 128  }
  0x43   : > { %663 = vsyncadd (%p942_p6), %s145_s8, 4294967168  ;;  %p943_p4 = scmp.eq.s32.totalorder %s736_s13, 0 }
  0x45   : > { %665 = dma.done.wait (%p943_p4), [#allocation6], 128   ;;  %p944_p8 = pmov %p943_p4 }
  0x46   : > { %v846_v0 = vld [vmem:[%s148_s21] sm:$0xff]  ;;  %s690_s17 = smov 94   ;;  %s691_s7 = smov 95   ;;  %v696_v2 = vmov 0.0   ;;  %v183_v3 = vlaneseq  ;;  %vm261_vm1 = vcmask 1043456   ;;  %vm277_vm2 = vcmask 1044480  }
  0x47   : > { %667 = vsyncadd (%p944_p8), [#allocation6], 4294967168  ;;  %230 = vrot.lane.b32.xlu1 %v846_v0, %s690_s17  ;;  %223 = vrot.lane.b32.xlu0 %v846_v0, %s691_s7  ;;  %v852_v1 = vcombine.high %v846_v0, %v846_v0  ;;  %s692_s15 = smov 110   ;;  %s693_s14 = smov 96   ;;  %v272_v54 = vld [vmem:[#allocation5] sm:$0xff]  ;;  %vm273_vm10 = vcmask 302080  }
  0x48   : > { %s694_s18 = smov 112   ;;  %s695_s19 = smov 111   ;;  %348 = vmatprep.mubr.f32.mxu0 %v696_v2  ;;  %v868_v4 = vand.u32 127, %v183_v3 }
  0x49   : > { %s697_s22 = smov 127   ;;  %s698_s23 = smov 126  }
  0x4a   : > { %vm234_vm0 = vcmp.lt.s32.totalorder %v868_v4, 94  ;;  %vm227_vm3 = vcmp.lt.s32.totalorder %v868_v4, 95  ;;  %vm220_vm4 = vcmp.lt.s32.totalorder %v868_v4, 96  ;;  %vm213_vm5 = vcmp.lt.s32.totalorder %v868_v4, 110  ;;  %s476_s24 = sshll.u32 %s834_s5, 4  ;;  %s488_s25 = sshll.u32 %s736_s13, 8 }
  0x4b   : > { %209 = vrot.lane.b32.xlu0 %v846_v0, %s692_s15  ;;  %232 = vrot.lane.b32.xlu1 %v852_v1, %s690_s17  ;;  %vm206_vm6 = vcmp.lt.s32.totalorder %v868_v4, 111  ;;  %vm199_vm7 = vcmp.lt.s32.totalorder %v868_v4, 112  ;;  %vm185_vm8 = vcmp.lt.s32.totalorder %v868_v4, 127  ;;  %vm192_vm9 = vcmp.lt.s32.totalorder %v868_v4, 126  ;;  %s172_s26 = scalar_lea.vmem [#allocation7], %s476_s24  ;;  %s384_s4 = scalar_lea.hbm %s928_s2, %s488_s25 }
  0x4c   : > { %s386_s27 = sshll.u32 %s172_s26, 4  ;;  %s372_s6 = scalar_lea.sflag [#allocation4], %s834_s5  ;;  %s387_s27 = int_to_ptr.vmem [resolvable:$true] %s386_s27 }
  0x4d   : > { %s618_s8 = scalar_lea.vmem %s387_s27, 256  ;;  %p945_p11 = scmp.ne.s32.totalorder %s939_s29, 0 }
  0x4e   : > { %p619_p9 = scmp.ne.s32.totalorder %s387_s27, %s618_s8  ;;  %s699_s21 = smov [#allocation7]  }
  0x4f   : > { %211 = vrot.lane.b32.xlu1 %v852_v1, %s692_s15  ;;  %225 = vrot.lane.b32.xlu0 %v852_v1, %s691_s7  ;;  %s622_s13 = sshll.u32 %s699_s21, 4  ;;  %s623_s13 = int_to_ptr.vmem [resolvable:$false] %s622_s13 }
  0x50   : > { %p620_p13 = pnand %p619_p9, %p945_p11  ;;  %s624_s17 = scalar_lea.vmem %s623_s13, 512 }
  0x51   : > { %p625_p1 = scmp.lt.s32.totalorder %s387_s27, %s623_s13  ;;  %p626_p2 = scmp.lt.s32.totalorder %s624_s17, %s618_s8 }
  0x52   : > { %p621_p10 = pneg %p620_p13 }
  0x53   : > { %218 = vrot.lane.b32.xlu1 %v852_v1, %s693_s14  ;;  %216 = vrot.lane.b32.xlu0 %v846_v0, %s693_s14  ;;  %p627_p0 = por %p626_p2, %p625_p1 }
  0x55   : > { %p628_p3 = pnand %p627_p0, %p621_p10 }
  0x57   : > { %197 = vrot.lane.b32.xlu1 %v852_v1, %s694_s18  ;;  %195 = vrot.lane.b32.xlu0 %v846_v0, %s694_s18 }
  0x5b   : > { %204 = vrot.lane.b32.xlu1 %v852_v1, %s695_s19  ;;  %202 = vrot.lane.b32.xlu0 %v846_v0, %s695_s19 }
  0x5f   : > { %181 = vrot.lane.b32.xlu1 %v852_v1, %s697_s22  ;;  %179 = vrot.lane.b32.xlu0 %v846_v0, %s697_s22 }
  0x63   : > { %190 = vrot.lane.b32.xlu1 %v852_v1, %s698_s23  ;;  %188 = vrot.lane.b32.xlu0 %v846_v0, %s698_s23 }
  0xb9   : > { %v231_v5 = vpop.permute.xlu1 %230  ;;  %v224_v6 = vpop.permute.xlu0 %223 }
  0xbd   : > { %v210_v7 = vpop.permute.xlu0 %209  ;;  %v233_v8 = vpop.permute.xlu1 %232 }
  0xbe   : > { %v235_v9 = vsel %vm234_vm0, %v231_v5, %v233_v8  ;;  %v236_v10 = vsel %vm234_vm0, %v233_v8, %v231_v5 }
  0xbf   : > { %v271_v11 = vsel %vm261_vm1, %v236_v10, 1.0  ;;  %v270_v12 = vsel %vm261_vm1, %v235_v9, 1.0 }
  0xc0   : > { %477 = vmatprep.subr.msk.mxu0 %vm277_vm2, %v271_v11 }
  0xc1   : > { %478 = vmatpush1.msk.msra.mxu0 %vm277_vm2, %v270_v12  ;;  %v212_v13 = vpop.permute.xlu1 %211  ;;  %v226_v14 = vpop.permute.xlu0 %225 }
  0xc2   : > { %v228_v15 = vsel %vm227_vm3, %v224_v6, %v226_v14  ;;  %v229_v16 = vsel %vm227_vm3, %v226_v14, %v224_v6  ;;  %v214_v27 = vsel %vm213_vm5, %v210_v7, %v212_v13  ;;  %v215_v28 = vsel %vm213_vm5, %v212_v13, %v210_v7 }
  0xc3   : > { %v257_v17 = vrot.slane %v228_v15, 4  ;;  %v258_v18 = vrot.slane %v229_v16, 4  ;;  %v251_v29 = vrot.slane %v214_v27, 4  ;;  %v252_v30 = vrot.slane %v215_v28, 4 }
  0xc5   : > { %v219_v19 = vpop.permute.xlu1 %218  ;;  %v217_v20 = vpop.permute.xlu0 %216 }
  0xc6   : > { %v221_v21 = vsel %vm220_vm4, %v217_v20, %v219_v19  ;;  %v222_v22 = vsel %vm220_vm4, %v219_v19, %v217_v20 }
  0xc7   : > { %v269_v23 = vsel %vm261_vm1, %v222_v22, %v258_v18  ;;  %v268_v24 = vsel %vm261_vm1, %v221_v21, %v257_v17 }
  0xc8   : > { %308 = vmatprep.subr.mxu0 %v269_v23 }
  0xc9   : > { %v198_v25 = vpop.permute.xlu1 %197  ;;  %309 = vmatpush1.msra.mxu0 %v268_v24  ;;  %v196_v26 = vpop.permute.xlu0 %195 }
  0xca   : > { %v200_v39 = vsel %vm199_vm7, %v196_v26, %v198_v25  ;;  %v201_v40 = vsel %vm199_vm7, %v198_v25, %v196_v26 }
  0xcb   : > { %v245_v43 = vrot.slane %v200_v39, 4  ;;  %v246_v44 = vrot.slane %v201_v40, 4 }
  0xcd   : > { %v205_v31 = vpop.permute.xlu1 %204  ;;  %v203_v32 = vpop.permute.xlu0 %202 }
  0xce   : > { %v207_v33 = vsel %vm206_vm6, %v203_v32, %v205_v31  ;;  %v208_v34 = vsel %vm206_vm6, %v205_v31, %v203_v32 }
  0xcf   : > { %v267_v35 = vsel %vm261_vm1, %v208_v34, %v252_v30  ;;  %v266_v36 = vsel %vm261_vm1, %v207_v33, %v251_v29 }
  0xd0   : > { %310 = vmatprep.subr.mxu0 %v267_v35 }
  0xd1   : > { %v182_v37 = vpop.permute.xlu1 %181  ;;  %311 = vmatpush1.msra.mxu0 %v266_v36  ;;  %v180_v38 = vpop.permute.xlu0 %179 }
  0xd2   : > { %v187_v41 = vsel %vm185_vm8, %v182_v37, %v180_v38  ;;  %v186_v42 = vsel %vm185_vm8, %v180_v38, %v182_v37 }
  0xd3   : > { %v240_v45 = vrot.slane %v187_v41, 4  ;;  %v239_v48 = vrot.slane %v186_v42, 4 }
  0xd5   : > { %v191_v46 = vpop.permute.xlu1 %190  ;;  %v189_v47 = vpop.permute.xlu0 %188  ;;  %v263_v53 = vsel %vm261_vm1, %v852_v1, %v240_v45  ;;  %v262_v55 = vsel %vm261_vm1, %v846_v0, %v239_v48 }
  0xd6   : > { %v193_v49 = vsel %vm192_vm9, %v189_v47, %v191_v46  ;;  %v194_v50 = vsel %vm192_vm9, %v191_v46, %v189_v47 }
  0xd7   : > { %v265_v51 = vsel %vm261_vm1, %v194_v50, %v246_v44  ;;  %v264_v52 = vsel %vm261_vm1, %v193_v49, %v245_v43 }
  0xd8   : > { %312 = vmatprep.subr.mxu0 %v265_v51 }
  0xd9   : > { %313 = vmatpush1.msra.mxu0 %v264_v52 }
  0xda   : > { %314 = vmatprep.subr.mxu0 %v263_v53 }
  0xdb   : > { %315 = vmatpush1.msra.mxu0 %v262_v55 }
  0xdc   : > { %479 = vmatmul.mubr.msk.f32.vlgmr.msra.gmra.mxu0 %vm273_vm10, %v272_v54 }
 0x19c   : > { %v350_v56 = vpop.f32.mrf.mxu0 }
 0x19d   : > { %v480_v57 = vmul.f32 -1.442695, %v350_v56 }
 0x19e   : > { %v352_v58 = vpop.f32.mrf.mxu0 }
 0x19f   : > { %556 = vpow2.f32 %v480_v57  ;;  %v481_v59 = vmul.f32 -1.442695, %v352_v58 }
 0x1a1   : > { %558 = vpow2.f32 %v481_v59 }
 0x1ac   : > { %v557_v60 = vpop.eup %556 }
 0x1ad   : > { %v361_v61 = vadd.f32 1.0, %v557_v60 }
 0x1ae   : > { %v559_v62 = vpop.eup %558 }
 0x1af   : > { %560 = vrcp.f32 %v361_v61  ;;  %v362_v63 = vadd.f32 1.0, %v559_v62 }
 0x1b1   : > { %562 = vrcp.f32 %v362_v63 }
 0x1bc   : > { %v561_v1 = vpop.eup %560 }
 0x1bd   : > { %v367_v0 = vmul.f32 %v561_v1, %v350_v56 }
 0x1be   : > { %v563_v2 = vpop.eup %562 }
 0x1bf   : > { %369 = vst [vmem:[%s172_s26] sm:$0xff] %v367_v0  ;;  %v368_v3 = vmul.f32 %v563_v2, %v352_v58 }
 0x1c1   : > { %370 = vst [vmem:[%s172_s26 + $0x8] sm:$0xff] %v368_v3 }
 0x1c2   : > { %631 = shalt.err (!%p628_p3)
}
 0x1c3   : > { %s632_s7 = scalar_lea.hbm %s384_s4, 256  ;;  %s636_s14 = scalar_lea.hbm %s928_s2, 512 }
 0x1c4   : > { %p633_p12 = scmp.ne.s32.totalorder %s384_s4, %s632_s7  ;;  %p637_p6 = scmp.lt.s32.totalorder %s384_s4, %s928_s2 }
 0x1c5   : > { %p638_p4 = scmp.lt.s32.totalorder %s636_s14, %s632_s7 }
 0x1c6   : > { %p634_p5 = pnand %p633_p12, %p945_p11 }
 0x1c7   : > { %p639_p8 = por %p638_p4, %p637_p6 }
 0x1c8   : > { %p635_p7 = pneg %p634_p5 }
 0x1ca   : > { %p640_p9 = pnand %p639_p8, %p635_p7 }
 0x1cc   : > { %643 = shalt.err (!%p640_p9)
}
 0x1cd   : > { %495 = dma.vmem_to_hbm [thread:$0]  (%p945_p11), %s387_s27, 256, %s384_s4, %s372_s6  }
 0x1ce PF: > { %s398_s22 = sand.u32 1, %s674_s9   ;;  %p946_p13 = scmp.ne.s32.totalorder %s934_s16, 0 }
 0x1cf   : > { %p947_p10 = scmp.ge.s32.totalorder %s686_s12, 2  ;;  %s399_s23 = scalar_lea.sflag [#allocation4], %s398_s22 }
 0x1d1   : > { %p506_p1 = pnand %p947_p10, %p946_p13 }
 0x1d3   : > { %p507_p2 = pneg %p506_p1 }
 0x1d5   : > { %669 = dma.done.wait (%p507_p2), %s399_s23, 256  }
 0x1d6   : > { %671 = vsyncadd (%p507_p2), %s399_s23, 4294967040  ;;  %p16_p0 = scmp.ge.s32.totalorder %s763_s20, 4   ;;  %s948_s9 = smov %s678_s10 }
 0x1d7   : > { %s949_s10 = smov %s682_s11  ;;  %s950_s11 = smov %s790_s28 }
 0x1d8   : > { %s951_s12 = smov %s763_s20  ;;  %18 = sbr.rel (!%p16_p0) target bundleno = 6 (0x6), region = 77 }
 0x1dd   :  { %404 = vsyncpa [#allocation3], 1 }
 0x1de   :  { %406 = vsyncpa [#allocation3 + $0x1], 1 }
 0x1df   :  { %407 = vsyncpa [#allocation6], 1 }
 0x1e0   :  { %408 = vsyncpa [#allocation4], 1 }
 0x1e1   :  { %410 = vsyncpa [#allocation4 + $0x1], 1 }

</bundles_post_ra>
